<compile_context>
chip_gen: v6e
topology: v6e:2x2x1
jax: 0.10.0
libtpu: 0.0.40
codegen_flags: <defaults>
</compile_context>

<pallas_src>
import jax
import jax.numpy as jnp
from jax import lax
from jax.experimental import pallas as pl
from jax.experimental.pallas import tpu as pltpu


# ----------------------------------------------------------------------------
# Elementwise activation kernels (TruncationActivation / ShrinkageActivation)
# ----------------------------------------------------------------------------

def _trunc_kernel(eps_ref, x_ref, o_ref):
    # eps_ref: SMEM (1,) f32; x_ref/o_ref: VMEM (block_rows, lanes)
    eps = eps_ref[0].astype(x_ref.dtype)
    o_ref[...] = jnp.clip(x_ref[...], -eps, eps)


def _shrink_kernel(eps_ref, x_ref, o_ref):
    # soft-threshold: sign(x)*max(|x|-eps, 0) == x - clip(x, -eps, eps)
    eps = eps_ref[0].astype(x_ref.dtype)
    x = x_ref[...]
    o_ref[...] = x - jnp.clip(x, -eps, eps)


def _pick_lanes(n):
    """Widest lane extent (multiple of 128) dividing n, preferring >= 8 rows."""
    best = None
    for lanes in (1024, 512, 256, 128):
        if n % lanes == 0:
            if best is None:
                best = lanes
            if n // lanes >= 8:
                return lanes, False
    if best is not None:
        return best, False
    return 128, True  # ragged size: needs a (<128 element) tail pad


def _elementwise_call(kernel, x, epsilon, *, target_block_bytes=1 << 20):
    orig_shape = x.shape
    dtype = x.dtype
    itemsize = jnp.dtype(dtype).itemsize
    n = x.size

    lanes, needs_pad = _pick_lanes(n)
    flat = x.reshape(-1)                      # free (row-major view)
    if needs_pad:
        # Fallback only for sizes not divisible by 128 (never hit by DECONET shapes).
        pad = (-n) % lanes
        flat = jnp.pad(flat, (0, pad))
    rows = flat.size // lanes
    x2d = flat.reshape(rows, lanes)           # free (row-major view)

    # Block sizing: ~1 MiB blocks (>= 85% of HBM roofline), 4x double-buffered
    # in+out = ~4 MiB, safe for v5e (16 MiB) / v6e,v7x (32 MiB) scoped VMEM.
    target_rows = max(8, (target_block_bytes // (lanes * itemsize)) // 8 * 8)
    if rows <= 8:
        block_rows = rows                     # full extent (tiny input)
    else:
        # keep at least 2 grid blocks when possible so v7x can shard across 2 TCs
        half = ((pl.cdiv(rows, 2) + 7) // 8) * 8
        block_rows = max(8, min(target_rows, half))
    grid = (pl.cdiv(rows, block_rows),)

    eps_arr = jnp.asarray(epsilon, dtype=jnp.float32).reshape(1)

    out2d = pl.pallas_call(
        kernel,
        out_shape=jax.ShapeDtypeStruct((rows, lanes), dtype),
        grid_spec=pltpu.PrefetchScalarGridSpec(
            num_scalar_prefetch=0,
            grid=grid,
            in_specs=[
                pl.BlockSpec(memory_space=pltpu.MemorySpace.SMEM),
                pl.BlockSpec((block_rows, lanes), lambda i: (i, 0)),
            ],
            out_specs=pl.BlockSpec((block_rows, lanes), lambda i: (i, 0)),
        ),
        compiler_params=pltpu.CompilerParams(
            dimension_semantics=("parallel",)),
        cost_estimate=pl.CostEstimate(
            flops=2 * n, transcendentals=0, bytes_accessed=2 * n * itemsize),
    )(eps_arr, x2d)

    out = out2d.reshape(-1)
    if out.size != n:          # only in the ragged-pad fallback
        out = out[:n]
    return out.reshape(orig_shape)


def truncation_activation(x, epsilon):
    """sign(x) * min(|x|, eps) elementwise (eps >= 0, the DECONET case)."""
    return _elementwise_call(_trunc_kernel, x, epsilon)


def shrinkage_activation(x, epsilon):
    """sign(x) * max(|x| - eps, 0) elementwise (eps >= 0, the DECONET case)."""
    return _elementwise_call(_shrink_kernel, x, epsilon)


# ----------------------------------------------------------------------------
# Fused DECONET inner-step kernel: phi-matmul + affine + truncation epilogue
#   z1_new = clip((1-theta)*u1 + theta*z1 - (t/theta) * (x @ W^T), -eps, eps)
# ----------------------------------------------------------------------------

def _fused_affine_trunc_kernel(scal_ref, u_ref, z_ref, x_ref, w_ref, o_ref, acc_ref):
    k = pl.program_id(1)

    @pl.when(k == 0)
    def _():
        acc_ref[...] = jnp.zeros_like(acc_ref)

    # x_ref: (B, tk), w_ref: (tn, tk) -> contract on last dims -> (B, tn)
    acc_ref[...] += lax.dot_general(
        x_ref[...], w_ref[...],
        dimension_numbers=(((1,), (1,)), ((), ())),
        preferred_element_type=jnp.float32)

    @pl.when(k == pl.num_programs(1) - 1)
    def _():
        one_m_theta = scal_ref[0]
        theta = scal_ref[1]
        t_over_theta = scal_ref[2]
        eps = scal_ref[3]
        aff = (one_m_theta * u_ref[...].astype(jnp.float32)
               + theta * z_ref[...].astype(jnp.float32)
               - t_over_theta * acc_ref[...])
        o_ref[...] = jnp.clip(aff, -eps, eps).astype(o_ref.dtype)


def fused_affine_truncate(u, z, x, w, theta, t, eps, *, tn=256, tk=256):
    """clip((1-theta)*u + theta*z - (t/theta) * (x @ w.T), -eps, eps) in one pass."""
    B, K = x.shape
    S, K2 = w.shape
    assert K == K2 and u.shape == (B, S) and z.shape == (B, S)
    tn = min(tn, S)
    tk = min(tk, K)
    assert S % tn == 0 and K % tk == 0, "tile sizes must divide (S, K)"

    scal = jnp.asarray([1.0 - theta, theta, t / theta, eps], dtype=jnp.float32)
    grid = (S // tn, K // tk)
    itemsize = jnp.dtype(x.dtype).itemsize

    return pl.pallas_call(
        _fused_affine_trunc_kernel,
        out_shape=jax.ShapeDtypeStruct((B, S), x.dtype),
        grid_spec=pltpu.PrefetchScalarGridSpec(
            num_scalar_prefetch=0,
            grid=grid,
            in_specs=[
                pl.BlockSpec(memory_space=pltpu.MemorySpace.SMEM),
                pl.BlockSpec((B, tn), lambda n, k: (0, n)),   # u
                pl.BlockSpec((B, tn), lambda n, k: (0, n)),   # z
                pl.BlockSpec((B, tk), lambda n, k: (0, k)),   # x
                pl.BlockSpec((tn, tk), lambda n, k: (n, k)),  # w (phi)
            ],
            out_specs=pl.BlockSpec((B, tn), lambda n, k: (0, n)),
            scratch_shapes=[pltpu.VMEM((B, tn), jnp.float32)],
        ),
        compiler_params=pltpu.CompilerParams(
            dimension_semantics=("parallel", "arbitrary")),
        cost_estimate=pl.CostEstimate(
            flops=2 * B * S * K + 6 * B * S,
            transcendentals=0,
            bytes_accessed=(B * K + S * K + 3 * B * S) * itemsize),
    )(scal, u, z, x, w)


# ----------------------------------------------------------------------------
# Test
# ----------------------------------------------------------------------------

if __name__ == "__main__":
    key = jax.random.PRNGKey(0)
    k1, k2, k3, k4, k5 = jax.random.split(key, 5)

    # --- elementwise activation kernels (NCHW MNIST-ish input) ---
    x = jax.random.normal(k1, (2, 4, 16, 16), dtype=jnp.float32)
    eps = 0.5
    out_t = truncation_activation(x, eps)
    out_s = shrinkage_activation(x, eps)
    jax.block_until_ready((out_t, out_s))

    ref_t = jnp.sign(x) * jnp.minimum(jnp.abs(x), eps * jnp.ones_like(x))
    ref_s = jnp.sign(x) * jnp.maximum(jnp.zeros_like(x), jnp.abs(x) - eps)
    assert out_t.shape == x.shape and out_t.dtype == x.dtype
    assert out_s.shape == x.shape and out_s.dtype == x.dtype
    assert jnp.allclose(out_t, ref_t, atol=1e-6), "truncation mismatch vs reference"
    assert jnp.allclose(out_s, ref_s, atol=1e-6), "shrinkage mismatch vs reference"

    # --- fused DECONET inner step: phi-matmul + affine + truncation epilogue ---
    B, ambient, sparse = 2, 256, 512          # small DECONET-like dims
    xb = jax.random.normal(k2, (B, ambient), dtype=jnp.float32)
    phi = jax.random.normal(k3, (sparse, ambient), dtype=jnp.float32) * (2.0 / ambient) ** 0.5
    u1 = jax.random.normal(k4, (B, sparse), dtype=jnp.float32)
    z1 = jax.random.normal(k5, (B, sparse), dtype=jnp.float32)
    theta1, t1 = 0.8, 1.0
    eps1 = t1 / theta1                        # DECONET: first_activation(w1, t1/theta1)

    z1_new = fused_affine_truncate(u1, z1, xb, phi, theta1, t1, eps1)
    z1_new = jax.block_until_ready(z1_new)

    aff_ref = ((1.0 - theta1) * u1 + theta1 * z1
               - (t1 / theta1) * jnp.einsum('sa,ba->bs', phi, xb,
                                            precision=jax.lax.Precision.HIGHEST))
    ref_fused = jnp.clip(aff_ref, -eps1, eps1)
    assert z1_new.shape == (B, sparse) and z1_new.dtype == jnp.float32
    assert jnp.allclose(z1_new, ref_fused, rtol=5e-3, atol=2e-2), \
        "fused affine+truncation mismatch vs reference"

    print("KERNEL_OK")
</pallas_src>

<mosaic_0001>
module attributes {stable_mosaic.version = 11 : i64} {
  func.func @_trunc_kernel(%arg0: i32, %arg1: memref<1xf32, #tpu.memory_space<smem>>, %arg2: memref<8x256xf32, #tpu.memory_space<vmem>>, %arg3: memref<8x256xf32, #tpu.memory_space<vmem>>) attributes {dimension_semantics = [#tpu.dimension_semantics<parallel>], iteration_bounds = array<i64: 1>, scalar_prefetch = 0 : i64, scratch_operands = 0 : i64, tpu.core_type = #tpu.core_type<tc>, window_params = [{transform_indices = @transform_0, window_bounds = array<i64: 1>}, {transform_indices = @transform_1, window_bounds = array<i64: 8, 256>}, {transform_indices = @transform_2, window_bounds = array<i64: 8, 256>}]} {
    %c0 = arith.constant 0 : index
    %0 = memref.load %arg1[%c0] : memref<1xf32, #tpu.memory_space<smem>>
    %c0_0 = arith.constant 0 : index
    %c0_1 = arith.constant 0 : index
    %1 = vector.load %arg2[%c0_0, %c0_1] : memref<8x256xf32, #tpu.memory_space<vmem>>, vector<8x256xf32>
    %cst = arith.constant 0.000000e+00 : f32
    %2 = arith.subf %cst, %0 : f32
    %3 = vector.broadcast %2 : f32 to vector<8x256xf32>
    %4 = arith.maximumf %3, %1 : vector<8x256xf32>
    %5 = vector.broadcast %0 : f32 to vector<8x256xf32>
    %6 = arith.minimumf %5, %4 : vector<8x256xf32>
    %c0_2 = arith.constant 0 : index
    %c0_3 = arith.constant 0 : index
    %7 = vector.load %arg3[%c0_2, %c0_3] : memref<8x256xf32, #tpu.memory_space<vmem>>, vector<8x256xf32>
    tpu.vector_store %arg3[%c0_2, %c0_3], %6 {strides = array<i32>} : memref<8x256xf32, #tpu.memory_space<vmem>>, vector<8x256xf32>,
    return
  }
  func.func @transform_0(%arg0: i32) -> i32 {
    %c0_i32 = arith.constant 0 : i32
    %c0_i32_0 = arith.constant 0 : i32
    return %c0_i32 : i32
  }
  func.func @transform_1(%arg0: i32) -> (i32, i32) {
    %c0_i32 = arith.constant 0 : i32
    %c0_i32_0 = arith.constant 0 : i32
    return %arg0, %c0_i32 : i32, i32
  }
  func.func @transform_2(%arg0: i32) -> (i32, i32) {
    %c0_i32 = arith.constant 0 : i32
    %c0_i32_0 = arith.constant 0 : i32
    return %arg0, %c0_i32 : i32, i32
  }
}

</mosaic_0001>

<bundles_post_ra>
// kernel: tpu_custom_call.1
= control target key start
LH: loop header
LB: loop body
LE: loop exit
PB: predicated region body
PF: predicated region fallthrough
CT: control target
= control target key end

     0   :  { %8 = vsyncpa [#allocation4], 0  ;;  %s127_s0 = inlined_call_operand.<no memory space> [shape: f32[1], index: 0, kind: input, shape index: {}]   ;;  %s128_s1 = inlined_call_operand.hbm [shape: f32[8,256], index: 1, kind: input, shape index: {}]   ;;  %s129_s2 = inlined_call_operand.hbm [shape: f32[8,256], index: 2, kind: output, shape index: {}]  }
   0x1   :  { %9 = vsyncpa [#allocation5], 0  ;;  %s98_s9 = smov [#allocation3]  }
   0x2   :  { %s18_s10 = sshll.u32 %s98_s9, 4  ;;  %s19_s10 = int_to_ptr.vmem [resolvable:$true] %s18_s10 }
   0x3   :  { %s62_s11 = scalar_lea.vmem %s19_s10, 256  ;;  %p67_p1 = scmp.lt.s32.totalorder %s19_s10, %s19_s10 }
   0x4   :  { %p63_p0 = scmp.ne.s32.totalorder %s19_s10, %s62_s11  ;;  %p68_p2 = scmp.lt.s32.totalorder %s62_s11, %s62_s11 }
   0x6   :  { %p69_p3 = por %p68_p2, %p67_p1 }
   0x8   :  { %p70_p4 = pnand %p69_p3, %p63_p0 }
   0xa   :  { %73 = shalt.err (!%p70_p4)
}
   0xb   :  { %21 = dma.hbm_to_vmem [thread:$0]  %s128_s1, 256, %s19_s10, [#allocation4]  }
   0xc   :  { %94 = dma.done.wait [#allocation4], 256  }
   0xd   :  { %95 = vsyncadd [#allocation4], 4294967040  ;;  %s28_s16 = ssub.f32 0.0, %s127_s0  ;;  %v26_v1 = vld [vmem:[#allocation3] sm:$0xff]  ;;  %v32_v2 = vstv %s127_s0  ;;  %v27_v3 = vld [vmem:[#allocation3 + $0x8] sm:$0xff]  ;;  %s99_s19 = smov [#allocation6]  }
   0xe   :  { %s43_s20 = sshll.u32 %s99_s19, 4  ;;  %s44_s20 = int_to_ptr.vmem [resolvable:$true] %s43_s20 }
   0xf   :  { %v29_v0 = vstv %s28_s16  ;;  %s74_s1 = scalar_lea.vmem %s44_s20, 256  ;;  %p79_p6 = scmp.lt.s32.totalorder %s44_s20, %s44_s20 }
  0x10   :  { %v30_v4 = vmax.f32 %v29_v0, %v26_v1  ;;  %v31_v5 = vmax.f32 %v29_v0, %v27_v3  ;;  %p75_p5 = scmp.ne.s32.totalorder %s44_s20, %s74_s1  ;;  %p80_p7 = scmp.lt.s32.totalorder %s74_s1, %s74_s1 }
  0x12   :  { %v33_v6 = vmin.f32 %v32_v2, %v30_v4  ;;  %v34_v7 = vmin.f32 %v32_v2, %v31_v5  ;;  %p81_p8 = por %p80_p7, %p79_p6 }
  0x14   :  { %35 = vst [vmem:[#allocation6] sm:$0xff] %v33_v6  ;;  %36 = vst [vmem:[#allocation6 + $0x8] sm:$0xff] %v34_v7  ;;  %p82_p9 = pnand %p81_p8, %p75_p5 }
  0x16   :  { %85 = shalt.err (!%p82_p9)
}
  0x17   :  { %46 = dma.vmem_to_hbm [thread:$0]  %s44_s20, 256, %s129_s2, [#allocation5]  }
  0x18   :  { %96 = dma.done.wait [#allocation5], 256  }
  0x19   :  { %97 = vsyncadd [#allocation5], 4294967040 }
  0x1a   :  { %50 = vsyncpa [#allocation4], 1 }
  0x1b   :  { %51 = vsyncpa [#allocation5], 1 }

</bundles_post_ra>
